<compile_context>
chip_gen: v6e
topology: v6e:2x2x1
jax: 0.10.0
libtpu: 0.0.40
codegen_flags: <defaults>
</compile_context>

<pallas_src>
import functools

import jax
import jax.numpy as jnp
from jax.experimental import pallas as pl
from jax.experimental.pallas import tpu as pltpu  # noqa: F401  (TPU backend)

BN_EPS = 1e-5
LANE = 128


def _round_up(n, m):
    return ((n + m - 1) // m) * m


def _bn_train(h, gamma, beta):
    """BatchNorm1d, training mode, two-pass mean/var, fused scale/shift (f32)."""
    inv_n = 1.0 / h.shape[0]
    mean = jnp.sum(h, axis=0, keepdims=True) * inv_n
    d = h - mean
    var = jnp.sum(d * d, axis=0, keepdims=True) * inv_n  # biased var (PyTorch)
    scale = gamma * jax.lax.rsqrt(var + BN_EPS)
    return d * scale + beta


def nnmnist_kernel(x_ref, w1_ref, w2_ref, w3_ref, wo_ref, vec_ref, bo_ref, o_ref):
    # Packed per-layer vectors: rows = [b1,g1,be1, b2,g2,be2, b3,g3,be3].
    vec = vec_ref[...]
    b1, g1, be1 = vec[0:1, :], vec[1:2, :], vec[2:3, :]
    b2, g2, be2 = vec[3:4, :], vec[4:5, :], vec[5:6, :]
    b3, g3, be3 = vec[6:7, :], vec[7:8, :], vec[8:9, :]

    # fc1 -> relu -> bn1   (bf16 MXU operands, f32 accumulate, f32 BN on VPU)
    h = jnp.dot(x_ref[...].astype(jnp.bfloat16), w1_ref[...],
                preferred_element_type=jnp.float32) + b1
    h = jnp.maximum(h, 0.0)
    h = _bn_train(h, g1, be1)

    # fc2 -> relu -> bn2
    h = jnp.dot(h.astype(jnp.bfloat16), w2_ref[...],
                preferred_element_type=jnp.float32) + b2
    h = jnp.maximum(h, 0.0)
    h = _bn_train(h, g2, be2)

    # fc3 -> relu -> bn3
    h = jnp.dot(h.astype(jnp.bfloat16), w3_ref[...],
                preferred_element_type=jnp.float32) + b3
    h = jnp.maximum(h, 0.0)
    h = _bn_train(h, g3, be3)

    # output head (lane-dense padded width; sliced outside the kernel)
    o_ref[...] = (
        jnp.dot(h.astype(jnp.bfloat16), wo_ref[...],
                preferred_element_type=jnp.float32) + bo_ref[...]
    )


def _full_spec(shape):
    # Whole array as one block (block_shape == array dims satisfies tiling rules).
    return pl.BlockSpec(shape, lambda: tuple(0 for _ in shape))


@functools.partial(jax.jit, static_argnames=("out_dim",))
def nnmnist_forward(x, packed_params, out_dim):
    (w1, w2, w3, wo, vec9, bo) = packed_params
    B = x.shape[0]
    IN_P = w1.shape[0]          # padded input dim (multiple of 128)
    HP = w1.shape[1]            # padded hidden dim
    OP = wo.shape[1]            # padded output dim

    # Lane-dense input: zero-pad features to IN_P outside the kernel (neutral,
    # w1's extra rows are zero).
    x_p = jnp.pad(x, ((0, 0), (0, IN_P - x.shape[1])))

    operands = (x_p, w1, w2, w3, wo, vec9, bo)

    flops = 2 * B * (IN_P * HP + HP * HP + HP * HP + HP * OP)
    bytes_accessed = sum(a.size * a.dtype.itemsize for a in operands)
    bytes_accessed += B * OP * 4
    cost = pl.CostEstimate(
        flops=flops, transcendentals=3 * HP, bytes_accessed=bytes_accessed
    )

    out_padded = pl.pallas_call(
        nnmnist_kernel,
        out_shape=jax.ShapeDtypeStruct((B, OP), jnp.float32),
        grid=(),
        in_specs=[_full_spec(a.shape) for a in operands],
        out_specs=_full_spec((B, OP)),
        cost_estimate=cost,
    )(*operands)
    return out_padded[:, :out_dim]


def init_params(key, input_size, output_size, n_neurons):
    """Deterministic f32 parameters. Linear weights stored as (in, out)."""
    ks = jax.random.split(key, 8)

    def linear(kw, kb, fan_in, fan_out):
        bound = 1.0 / jnp.sqrt(fan_in)
        w = jax.random.uniform(kw, (fan_in, fan_out), jnp.float32, -bound, bound)
        b = jax.random.uniform(kb, (1, fan_out), jnp.float32, -bound, bound)
        return w, b

    w1, b1 = linear(ks[0], ks[1], input_size, n_neurons)
    w2, b2 = linear(ks[2], ks[3], n_neurons, n_neurons)
    w3, b3 = linear(ks[4], ks[5], n_neurons, n_neurons)
    wo, bo = linear(ks[6], ks[7], n_neurons, output_size)

    ones = jnp.ones((1, n_neurons), jnp.float32)
    zeros = jnp.zeros((1, n_neurons), jnp.float32)
    return (w1, b1, ones, zeros,
            w2, b2, ones, zeros,
            w3, b3, ones, zeros,
            wo, bo)


def prepare_params(params):
    """Pad input dim / hidden dim / output dim to multiples of 128, cast matmul
    weights to bf16, and pack the nine per-layer (1, H) vectors into a single
    (9, HP) f32 block (bias/gamma/beta x 3 layers).  Beta pads are 0 so padded
    hidden columns stay exactly 0 through BN."""
    (w1, b1, g1, be1, w2, b2, g2, be2, w3, b3, g3, be3, wo, bo) = params
    IN = w1.shape[0]
    H = w1.shape[1]
    OUT = wo.shape[1]
    IN_P = _round_up(IN, LANE)
    HP = _round_up(H, LANE)
    OP = _round_up(OUT, LANE)

    def pad2(a, rows, cols, val=0.0):
        return jnp.pad(a, ((0, rows - a.shape[0]), (0, cols - a.shape[1])),
                       constant_values=val)

    w1p = pad2(w1, IN_P, HP).astype(jnp.bfloat16)   # zero rows for padded inputs
    w2p = pad2(w2, HP, HP).astype(jnp.bfloat16)
    w3p = pad2(w3, HP, HP).astype(jnp.bfloat16)
    wop = pad2(wo, HP, OP).astype(jnp.bfloat16)

    # Packed (9, HP) f32 block: [b1,g1,be1, b2,g2,be2, b3,g3,be3].
    vec9 = jnp.concatenate(
        [pad2(b1, 1, HP), pad2(g1, 1, HP, val=1.0), pad2(be1, 1, HP),
         pad2(b2, 1, HP), pad2(g2, 1, HP, val=1.0), pad2(be2, 1, HP),
         pad2(b3, 1, HP), pad2(g3, 1, HP, val=1.0), pad2(be3, 1, HP)],
        axis=0,
    ).astype(jnp.float32)
    bop = pad2(bo, 1, OP)

    return (w1p, w2p, w3p, wop, vec9, bop)


def reference_forward(x, params):
    """Pure-JAX reference mirroring the PyTorch forward (training-mode BN),
    with matmuls in the same bf16-operand / f32-accumulate precision."""
    (w1, b1, g1, be1, w2, b2, g2, be2, w3, b3, g3, be3, wo, bo) = params

    def mm(a, w):
        return jnp.dot(a.astype(jnp.bfloat16), w.astype(jnp.bfloat16),
                       preferred_element_type=jnp.float32)

    def bn(h, g, b):
        m = jnp.mean(h, axis=0, keepdims=True)
        v = jnp.mean((h - m) ** 2, axis=0, keepdims=True)
        return (h - m) / jnp.sqrt(v + BN_EPS) * g + b

    h = bn(jnp.maximum(mm(x, w1) + b1, 0.0), g1, be1)
    h = bn(jnp.maximum(mm(h, w2) + b2, 0.0), g2, be2)
    h = bn(jnp.maximum(mm(h, w3) + b3, 0.0), g3, be3)
    return mm(h, wo) + bo


if __name__ == "__main__":
    key = jax.random.PRNGKey(0)
    k_x, k_p = jax.random.split(key)

    batch = 16
    input_size = 64      # small stand-in for MNIST's 784
    n_neurons = 200
    output_size = 10

    x = jax.random.normal(k_x, (batch, input_size), jnp.float32)
    params = init_params(k_p, input_size, output_size, n_neurons)
    packed_params = prepare_params(params)

    out = nnmnist_forward(x, packed_params, output_size)
    out = jax.block_until_ready(out)

    ref = reference_forward(x, params)
    assert out.shape == (batch, output_size)
    assert jnp.allclose(out, ref, atol=2e-2, rtol=2e-2), float(
        jnp.max(jnp.abs(out - ref))
    )

    print("KERNEL_OK")
</pallas_src>

<mosaic_0001>
module attributes {stable_mosaic.version = 11 : i64} {
  func.func @nnmnist_kernel(%arg0: memref<16x128xf32, #tpu.memory_space<vmem>>, %arg1: memref<128x256xbf16, #tpu.memory_space<vmem>>, %arg2: memref<256x256xbf16, #tpu.memory_space<vmem>>, %arg3: memref<256x256xbf16, #tpu.memory_space<vmem>>, %arg4: memref<256x128xbf16, #tpu.memory_space<vmem>>, %arg5: memref<9x256xf32, #tpu.memory_space<vmem>>, %arg6: memref<1x128xf32, #tpu.memory_space<vmem>>, %arg7: memref<16x128xf32, #tpu.memory_space<vmem>>) attributes {dimension_semantics = [], scalar_prefetch = 0 : i64, scratch_operands = 0 : i64, tpu.core_type = #tpu.core_type<tc>} {
    %c0 = arith.constant 0 : index
    %c0_0 = arith.constant 0 : index
    %0 = vector.load %arg5[%c0, %c0_0] : memref<9x256xf32, #tpu.memory_space<vmem>>, vector<9x256xf32>
    %1 = vector.extract_strided_slice %0 {offsets = [0, 0], sizes = [1, 256], strides = [1, 1]} : vector<9x256xf32> to vector<1x256xf32>
    %2 = vector.extract_strided_slice %0 {offsets = [1, 0], sizes = [1, 256], strides = [1, 1]} : vector<9x256xf32> to vector<1x256xf32>
    %3 = vector.extract_strided_slice %0 {offsets = [2, 0], sizes = [1, 256], strides = [1, 1]} : vector<9x256xf32> to vector<1x256xf32>
    %4 = vector.extract_strided_slice %0 {offsets = [3, 0], sizes = [1, 256], strides = [1, 1]} : vector<9x256xf32> to vector<1x256xf32>
    %5 = vector.extract_strided_slice %0 {offsets = [4, 0], sizes = [1, 256], strides = [1, 1]} : vector<9x256xf32> to vector<1x256xf32>
    %6 = vector.extract_strided_slice %0 {offsets = [5, 0], sizes = [1, 256], strides = [1, 1]} : vector<9x256xf32> to vector<1x256xf32>
    %7 = vector.extract_strided_slice %0 {offsets = [6, 0], sizes = [1, 256], strides = [1, 1]} : vector<9x256xf32> to vector<1x256xf32>
    %8 = vector.extract_strided_slice %0 {offsets = [7, 0], sizes = [1, 256], strides = [1, 1]} : vector<9x256xf32> to vector<1x256xf32>
    %9 = vector.extract_strided_slice %0 {offsets = [8, 0], sizes = [1, 256], strides = [1, 1]} : vector<9x256xf32> to vector<1x256xf32>
    %c0_1 = arith.constant 0 : index
    %c0_2 = arith.constant 0 : index
    %10 = vector.load %arg0[%c0_1, %c0_2] : memref<16x128xf32, #tpu.memory_space<vmem>>, vector<16x128xf32>
    %11 = arith.truncf %10 : vector<16x128xf32> to vector<16x128xbf16>
    %c0_3 = arith.constant 0 : index
    %c0_4 = arith.constant 0 : index
    %12 = vector.load %arg1[%c0_3, %c0_4] : memref<128x256xbf16, #tpu.memory_space<vmem>>, vector<128x256xbf16>
    %cst = arith.constant dense<0.000000e+00> : vector<16x256xf32>
    %13 = tpu.matmul %11, %12, %cst {dimension_numbers = #tpu.dot_dimension_numbers<[1], [0], [0], [1], [0, 0, 1, 1], [], []>} : vector<16x128xbf16>, vector<128x256xbf16>, vector<16x256xf32> -> vector<16x256xf32>
    %14 = vector.broadcast %1 : vector<1x256xf32> to vector<16x256xf32>
    %15 = arith.addf %13, %14 : vector<16x256xf32>
    %cst_5 = arith.constant 0.000000e+00 : f32
    %16 = vector.broadcast %cst_5 : f32 to vector<16x256xf32>
    %17 = arith.maximumf %15, %16 : vector<16x256xf32>
    %cst_6 = arith.constant dense<0.000000e+00> : vector<256xf32>
    %18 = vector.multi_reduction <add>, %17, %cst_6 [0] : vector<16x256xf32> to vector<256xf32>
    %19 = vector.shape_cast %18 : vector<256xf32> to vector<1x256xf32>
    %cst_7 = arith.constant 6.250000e-02 : f32
    %20 = vector.broadcast %cst_7 : f32 to vector<1x256xf32>
    %21 = arith.mulf %19, %20 : vector<1x256xf32>
    %22 = vector.broadcast %21 : vector<1x256xf32> to vector<16x256xf32>
    %23 = arith.subf %17, %22 : vector<16x256xf32>
    %24 = arith.mulf %23, %23 : vector<16x256xf32>
    %cst_8 = arith.constant dense<0.000000e+00> : vector<256xf32>
    %25 = vector.multi_reduction <add>, %24, %cst_8 [0] : vector<16x256xf32> to vector<256xf32>
    %26 = vector.shape_cast %25 : vector<256xf32> to vector<1x256xf32>
    %cst_9 = arith.constant 6.250000e-02 : f32
    %27 = vector.broadcast %cst_9 : f32 to vector<1x256xf32>
    %28 = arith.mulf %26, %27 : vector<1x256xf32>
    %cst_10 = arith.constant 9.99999974E-6 : f32
    %29 = vector.broadcast %cst_10 : f32 to vector<1x256xf32>
    %30 = arith.addf %28, %29 : vector<1x256xf32>
    %31 = math.rsqrt %30 : vector<1x256xf32>
    %32 = arith.mulf %2, %31 : vector<1x256xf32>
    %33 = vector.broadcast %32 : vector<1x256xf32> to vector<16x256xf32>
    %34 = arith.mulf %23, %33 : vector<16x256xf32>
    %35 = vector.broadcast %3 : vector<1x256xf32> to vector<16x256xf32>
    %36 = arith.addf %34, %35 : vector<16x256xf32>
    %37 = arith.truncf %36 : vector<16x256xf32> to vector<16x256xbf16>
    %c0_11 = arith.constant 0 : index
    %c0_12 = arith.constant 0 : index
    %38 = vector.load %arg2[%c0_11, %c0_12] : memref<256x256xbf16, #tpu.memory_space<vmem>>, vector<256x256xbf16>
    %cst_13 = arith.constant dense<0.000000e+00> : vector<16x256xf32>
    %39 = tpu.matmul %37, %38, %cst_13 {dimension_numbers = #tpu.dot_dimension_numbers<[1], [0], [0], [1], [0, 0, 1, 1], [], []>} : vector<16x256xbf16>, vector<256x256xbf16>, vector<16x256xf32> -> vector<16x256xf32>
    %40 = vector.broadcast %4 : vector<1x256xf32> to vector<16x256xf32>
    %41 = arith.addf %39, %40 : vector<16x256xf32>
    %cst_14 = arith.constant 0.000000e+00 : f32
    %42 = vector.broadcast %cst_14 : f32 to vector<16x256xf32>
    %43 = arith.maximumf %41, %42 : vector<16x256xf32>
    %cst_15 = arith.constant dense<0.000000e+00> : vector<256xf32>
    %44 = vector.multi_reduction <add>, %43, %cst_15 [0] : vector<16x256xf32> to vector<256xf32>
    %45 = vector.shape_cast %44 : vector<256xf32> to vector<1x256xf32>
    %cst_16 = arith.constant 6.250000e-02 : f32
    %46 = vector.broadcast %cst_16 : f32 to vector<1x256xf32>
    %47 = arith.mulf %45, %46 : vector<1x256xf32>
    %48 = vector.broadcast %47 : vector<1x256xf32> to vector<16x256xf32>
    %49 = arith.subf %43, %48 : vector<16x256xf32>
    %50 = arith.mulf %49, %49 : vector<16x256xf32>
    %cst_17 = arith.constant dense<0.000000e+00> : vector<256xf32>
    %51 = vector.multi_reduction <add>, %50, %cst_17 [0] : vector<16x256xf32> to vector<256xf32>
    %52 = vector.shape_cast %51 : vector<256xf32> to vector<1x256xf32>
    %cst_18 = arith.constant 6.250000e-02 : f32
    %53 = vector.broadcast %cst_18 : f32 to vector<1x256xf32>
    %54 = arith.mulf %52, %53 : vector<1x256xf32>
    %cst_19 = arith.constant 9.99999974E-6 : f32
    %55 = vector.broadcast %cst_19 : f32 to vector<1x256xf32>
    %56 = arith.addf %54, %55 : vector<1x256xf32>
    %57 = math.rsqrt %56 : vector<1x256xf32>
    %58 = arith.mulf %5, %57 : vector<1x256xf32>
    %59 = vector.broadcast %58 : vector<1x256xf32> to vector<16x256xf32>
    %60 = arith.mulf %49, %59 : vector<16x256xf32>
    %61 = vector.broadcast %6 : vector<1x256xf32> to vector<16x256xf32>
    %62 = arith.addf %60, %61 : vector<16x256xf32>
    %63 = arith.truncf %62 : vector<16x256xf32> to vector<16x256xbf16>
    %c0_20 = arith.constant 0 : index
    %c0_21 = arith.constant 0 : index
    %64 = vector.load %arg3[%c0_20, %c0_21] : memref<256x256xbf16, #tpu.memory_space<vmem>>, vector<256x256xbf16>
    %cst_22 = arith.constant dense<0.000000e+00> : vector<16x256xf32>
    %65 = tpu.matmul %63, %64, %cst_22 {dimension_numbers = #tpu.dot_dimension_numbers<[1], [0], [0], [1], [0, 0, 1, 1], [], []>} : vector<16x256xbf16>, vector<256x256xbf16>, vector<16x256xf32> -> vector<16x256xf32>
    %66 = vector.broadcast %7 : vector<1x256xf32> to vector<16x256xf32>
    %67 = arith.addf %65, %66 : vector<16x256xf32>
    %cst_23 = arith.constant 0.000000e+00 : f32
    %68 = vector.broadcast %cst_23 : f32 to vector<16x256xf32>
    %69 = arith.maximumf %67, %68 : vector<16x256xf32>
    %cst_24 = arith.constant dense<0.000000e+00> : vector<256xf32>
    %70 = vector.multi_reduction <add>, %69, %cst_24 [0] : vector<16x256xf32> to vector<256xf32>
    %71 = vector.shape_cast %70 : vector<256xf32> to vector<1x256xf32>
    %cst_25 = arith.constant 6.250000e-02 : f32
    %72 = vector.broadcast %cst_25 : f32 to vector<1x256xf32>
    %73 = arith.mulf %71, %72 : vector<1x256xf32>
    %74 = vector.broadcast %73 : vector<1x256xf32> to vector<16x256xf32>
    %75 = arith.subf %69, %74 : vector<16x256xf32>
    %76 = arith.mulf %75, %75 : vector<16x256xf32>
    %cst_26 = arith.constant dense<0.000000e+00> : vector<256xf32>
    %77 = vector.multi_reduction <add>, %76, %cst_26 [0] : vector<16x256xf32> to vector<256xf32>
    %78 = vector.shape_cast %77 : vector<256xf32> to vector<1x256xf32>
    %cst_27 = arith.constant 6.250000e-02 : f32
    %79 = vector.broadcast %cst_27 : f32 to vector<1x256xf32>
    %80 = arith.mulf %78, %79 : vector<1x256xf32>
    %cst_28 = arith.constant 9.99999974E-6 : f32
    %81 = vector.broadcast %cst_28 : f32 to vector<1x256xf32>
    %82 = arith.addf %80, %81 : vector<1x256xf32>
    %83 = math.rsqrt %82 : vector<1x256xf32>
    %84 = arith.mulf %8, %83 : vector<1x256xf32>
    %85 = vector.broadcast %84 : vector<1x256xf32> to vector<16x256xf32>
    %86 = arith.mulf %75, %85 : vector<16x256xf32>
    %87 = vector.broadcast %9 : vector<1x256xf32> to vector<16x256xf32>
    %88 = arith.addf %86, %87 : vector<16x256xf32>
    %89 = arith.truncf %88 : vector<16x256xf32> to vector<16x256xbf16>
    %c0_29 = arith.constant 0 : index
    %c0_30 = arith.constant 0 : index
    %90 = vector.load %arg4[%c0_29, %c0_30] : memref<256x128xbf16, #tpu.memory_space<vmem>>, vector<256x128xbf16>
    %cst_31 = arith.constant dense<0.000000e+00> : vector<16x128xf32>
    %91 = tpu.matmul %89, %90, %cst_31 {dimension_numbers = #tpu.dot_dimension_numbers<[1], [0], [0], [1], [0, 0, 1, 1], [], []>} : vector<16x256xbf16>, vector<256x128xbf16>, vector<16x128xf32> -> vector<16x128xf32>
    %c0_32 = arith.constant 0 : index
    %c0_33 = arith.constant 0 : index
    %92 = vector.load %arg6[%c0_32, %c0_33] : memref<1x128xf32, #tpu.memory_space<vmem>>, vector<1x128xf32>
    %93 = vector.broadcast %92 : vector<1x128xf32> to vector<16x128xf32>
    %94 = arith.addf %91, %93 : vector<16x128xf32>
    %c0_34 = arith.constant 0 : index
    %c0_35 = arith.constant 0 : index
    %95 = vector.load %arg7[%c0_34, %c0_35] : memref<16x128xf32, #tpu.memory_space<vmem>>, vector<16x128xf32>
    tpu.vector_store %arg7[%c0_34, %c0_35], %94 {strides = array<i32>} : memref<16x128xf32, #tpu.memory_space<vmem>>, vector<16x128xf32>,
    return
  }
}

</mosaic_0001>

<bundles_post_ra>
// kernel: nnmnist_forward.1
= control target key start
LH: loop header
LB: loop body
LE: loop exit
PB: predicated region body
PF: predicated region fallthrough
CT: control target
= control target key end

     0   :  { %12 = vsyncpa [#allocation3], 0  ;;  %s1663_s0 = inlined_call_operand.vmem [shape: f32[16,128], index: 0, kind: input, shape index: {}]   ;;  %s1664_s1 = inlined_call_operand.hbm [shape: bf16[128,256], index: 1, kind: input, shape index: {}]   ;;  %s1665_s2 = inlined_call_operand.hbm [shape: bf16[256,256], index: 2, kind: input, shape index: {}]   ;;  %s1666_s3 = inlined_call_operand.hbm [shape: bf16[256,256], index: 3, kind: input, shape index: {}]   ;;  %s1667_s4 = inlined_call_operand.hbm [shape: bf16[256,128], index: 4, kind: input, shape index: {}]   ;;  %s1668_s5 = inlined_call_operand.vmem [shape: f32[9,256], index: 5, kind: input, shape index: {}]   ;;  %s1669_s6 = inlined_call_operand.vmem [shape: f32[1,128], index: 6, kind: input, shape index: {}]   ;;  %s1670_s7 = inlined_call_operand.hbm [shape: f32[16,128], index: 7, kind: output, shape index: {}]  }
   0x1   :  { %13 = vsyncpa [#allocation6], 0 }
   0x2   :  { %14 = vsyncpa [#allocation9], 0 }
   0x3   :  { %15 = vsyncpa [#allocation4], 0  ;;  %s1535_s24 = smov [#allocation5]   ;;  %s1536_s26 = smov [#allocation2]  }
   0x4   :  { %s35_s25 = sshll.u32 %s1535_s24, 4  ;;  %s23_s27 = sshll.u32 %s1536_s26, 4  ;;  %s36_s25 = int_to_ptr.vmem [resolvable:$true] %s35_s25  ;;  %s24_s27 = int_to_ptr.vmem [resolvable:$true] %s23_s27 }
   0x5   :  { %s1435_s28 = scalar_lea.vmem %s36_s25, 4096  ;;  %p1440_p1 = scmp.lt.s32.totalorder %s36_s25, %s36_s25 }
   0x6   :  { %p1436_p0 = scmp.ne.s32.totalorder %s36_s25, %s1435_s28  ;;  %p1441_p2 = scmp.lt.s32.totalorder %s1435_s28, %s1435_s28 }
   0x8   :  { %p1442_p3 = por %p1441_p2, %p1440_p1 }
   0xa   :  { %p1443_p4 = pnand %p1442_p3, %p1436_p0 }
   0xc   :  { %1446 = shalt.err (!%p1443_p4)
}
   0xd   :  { %s1537_s29 = smov 128   ;;  %s1538_s30 = smov 8  }
   0xe   :  { %41 = dma.hbm_to_vmem [thread:$0]  %s1665_s2, 4096, %s36_s25, [#allocation6], %s1537_s29, %s1537_s29, %s1538_s30  }
   0xf   :  { %s1455_s10 = scalar_lea.vmem %s24_s27, 2048  ;;  %p1460_p6 = scmp.lt.s32.totalorder %s24_s27, %s24_s27 }
  0x10   :  { %p1456_p5 = scmp.ne.s32.totalorder %s24_s27, %s1455_s10  ;;  %p1461_p7 = scmp.lt.s32.totalorder %s1455_s10, %s1455_s10 }
  0x12   :  { %p1462_p8 = por %p1461_p7, %p1460_p6 }
  0x14   :  { %p1463_p9 = pnand %p1462_p8, %p1456_p5 }
  0x16   :  { %1466 = shalt.err (!%p1463_p9)
}
  0x17   :  { %29 = dma.hbm_to_vmem [thread:$0]  %s1664_s1, 2048, %s24_s27, [#allocation3], %s1537_s29, %s1537_s29, %s1538_s30  }
  0x18   :  { %s1539_s13 = smov [#allocation7]   ;;  %s1540_s15 = smov [#allocation8]  }
  0x19   :  { %s47_s14 = sshll.u32 %s1539_s13, 4  ;;  %s59_s16 = sshll.u32 %s1540_s15, 4  ;;  %s48_s14 = int_to_ptr.vmem [resolvable:$true] %s47_s14  ;;  %s60_s16 = int_to_ptr.vmem [resolvable:$true] %s59_s16 }
  0x1a   :  { %s1475_s2 = scalar_lea.vmem %s48_s14, 4096  ;;  %p1480_p11 = scmp.lt.s32.totalorder %s48_s14, %s48_s14 }
  0x1b   :  { %p1476_p10 = scmp.ne.s32.totalorder %s48_s14, %s1475_s2  ;;  %p1481_p12 = scmp.lt.s32.totalorder %s1475_s2, %s1475_s2 }
  0x1d   :  { %p1482_p13 = por %p1481_p12, %p1480_p11 }
  0x1f   :  { %p1483_p0 = pnand %p1482_p13, %p1476_p10 }
  0x21   :  { %1486 = shalt.err (!%p1483_p0)
}
  0x22   :  { %53 = dma.hbm_to_vmem [thread:$0]  %s1666_s3, 4096, %s48_s14, [#allocation6], %s1537_s29, %s1537_s29, %s1538_s30  }
  0x23   :  { %s1495_s1 = scalar_lea.vmem %s60_s16, 2048  ;;  %p1500_p2 = scmp.lt.s32.totalorder %s60_s16, %s60_s16 }
  0x24   :  { %p1496_p1 = scmp.ne.s32.totalorder %s60_s16, %s1495_s1  ;;  %p1501_p3 = scmp.lt.s32.totalorder %s1495_s1, %s1495_s1 }
  0x26   :  { %p1502_p4 = por %p1501_p3, %p1500_p2 }
  0x28   :  { %p1503_p5 = pnand %p1502_p4, %p1496_p1 }
  0x2a   :  { %1506 = shalt.err (!%p1503_p5)
}
  0x2b   :  { %s1541_s19 = smov 64   ;;  %s1542_s20 = smov 4  }
  0x2c   :  { %65 = dma.hbm_to_vmem [thread:$0]  %s1667_s4, 2048, %s60_s16, [#allocation9], %s1541_s19, %s1541_s19, %s1542_s20  }
  0x2d   :  { %1527 = dma.done.wait [#allocation3], 2048  }
  0x2e   :  { %1528 = vsyncadd [#allocation3], 4294965248 }
  0x2f   :  { %1529 = dma.done.wait [#allocation6], 8192  }
  0x30   :  { %1530 = vsyncadd [#allocation6], 4294959104 }
  0x31   :  { %1531 = dma.done.wait [#allocation9], 2048  }
  0x32   :  { %1532 = vsyncadd [#allocation9], 4294965248  ;;  %v1543_v0 = vmov 0   ;;  %v1279_v1 = vld [vmem:[#allocation2 + $0x74] ss:$8 sps:$4 sm:$0xff]   ;;  %v87_v17 = vld [vmem:[%s1663_s0] sm:$0xff]  ;;  %v106_v52 = vlaneseq }
  0x33   :  { %226 = vmatprep.mubr.bf16.mxu0 %v1543_v0  ;;  %v1281_v2 = vld [vmem:[#allocation2 + $0x70] ss:$8 sps:$4 sm:$0xff]   ;;  %194 = vmatprep.subr.bf16.mxu0 %v1279_v1  ;;  %v1282_v3 = vld [vmem:[#allocation2 + $0x64] ss:$8 sps:$4 sm:$0xff]   ;;  %v1284_v4 = vld [vmem:[#allocation2 + $0x60] ss:$8 sps:$4 sm:$0xff]  }
  0x34   :  { %195 = vmatpush1.bf16.msra.mxu0 %v1281_v2  ;;  %v1285_v5 = vld [vmem:[#allocation2 + $0x54] ss:$8 sps:$4 sm:$0xff]   ;;  %v1287_v6 = vld [vmem:[#allocation2 + $0x50] ss:$8 sps:$4 sm:$0xff]   ;;  %v1288_v7 = vld [vmem:[#allocation2 + $0x44] ss:$8 sps:$4 sm:$0xff]  }
  0x35   :  { %196 = vmatprep.subr.bf16.mxu0 %v1282_v3  ;;  %v1290_v8 = vld [vmem:[#allocation2 + $0x40] ss:$8 sps:$4 sm:$0xff]   ;;  %v1291_v9 = vld [vmem:[#allocation2 + $0x34] ss:$8 sps:$4 sm:$0xff]   ;;  %v1293_v10 = vld [vmem:[#allocation2 + $0x30] ss:$8 sps:$4 sm:$0xff]  }
  0x36   :  { %v1294_v11 = vld [vmem:[#allocation2 + $0x24] ss:$8 sps:$4 sm:$0xff]   ;;  %v1296_v12 = vld [vmem:[#allocation2 + $0x20] ss:$8 sps:$4 sm:$0xff]   ;;  %v1297_v13 = vld [vmem:[#allocation2 + $0x14] ss:$8 sps:$4 sm:$0xff]  }
  0x37   :  { %v1299_v14 = vld [vmem:[#allocation2 + $0x10] ss:$8 sps:$4 sm:$0xff]   ;;  %v1300_v15 = vld [vmem:[#allocation2 + $0x4] ss:$8 sps:$4 sm:$0xff]   ;;  %v1302_v16 = vld [vmem:[#allocation2] ss:$8 sps:$4 sm:$0xff]  }
  0x38   :  { %197 = vmatpush1.bf16.msra.mxu0 %v1284_v4  ;;  %v88_v18 = vld [vmem:[%s1663_s0 + $0x8] sm:$0xff]  ;;  %v1303_v20 = vld [vmem:[#allocation5 + $0x74] ss:$8 sps:$4 sm:$0xff]   ;;  %v1305_v21 = vld [vmem:[#allocation5 + $0x70] ss:$8 sps:$4 sm:$0xff]   ;;  %v1612_v53 = vshrl.u32 %v106_v52, 7 }
  0x39   :  { %198 = vmatprep.subr.bf16.mxu0 %v1285_v5  ;;  %v89_v19 = vpack.c.bf16 %v88_v18, %v87_v17  ;;  %513 = vmatprep.subr.bf16.mxu1 %v1303_v20  ;;  %v1306_v22 = vld [vmem:[#allocation5 + $0x64] ss:$8 sps:$4 sm:$0xff]   ;;  %v1308_v23 = vld [vmem:[#allocation5 + $0x60] ss:$8 sps:$4 sm:$0xff]   ;;  %v1309_v24 = vld [vmem:[#allocation5 + $0x54] ss:$8 sps:$4 sm:$0xff]  }
  0x3a   :  { %514 = vmatpush1.bf16.msra.mxu1 %v1305_v21  ;;  %v1311_v25 = vld [vmem:[#allocation5 + $0x50] ss:$8 sps:$4 sm:$0xff]   ;;  %v1312_v26 = vld [vmem:[#allocation5 + $0x44] ss:$8 sps:$4 sm:$0xff]   ;;  %v1314_v27 = vld [vmem:[#allocation5 + $0x40] ss:$8 sps:$4 sm:$0xff]  }
  0x3b   :  { %515 = vmatprep.subr.bf16.mxu1 %v1306_v22  ;;  %v1315_v28 = vld [vmem:[#allocation5 + $0x34] ss:$8 sps:$4 sm:$0xff]   ;;  %v1317_v29 = vld [vmem:[#allocation5 + $0x30] ss:$8 sps:$4 sm:$0xff]   ;;  %v1318_v30 = vld [vmem:[#allocation5 + $0x24] ss:$8 sps:$4 sm:$0xff]  }
  0x3c   :  { %199 = vmatpush1.bf16.msra.mxu0 %v1287_v6  ;;  %v1320_v31 = vld [vmem:[#allocation5 + $0x20] ss:$8 sps:$4 sm:$0xff]   ;;  %v1321_v32 = vld [vmem:[#allocation5 + $0x14] ss:$8 sps:$4 sm:$0xff]   ;;  %v1323_v33 = vld [vmem:[#allocation5 + $0x10] ss:$8 sps:$4 sm:$0xff]  }
  0x3d   :  { %200 = vmatprep.subr.bf16.mxu0 %v1288_v7  ;;  %v1324_v34 = vld [vmem:[#allocation5 + $0x4] ss:$8 sps:$4 sm:$0xff]   ;;  %v1326_v35 = vld [vmem:[#allocation5] ss:$8 sps:$4 sm:$0xff]   ;;  %v1327_v36 = vld [vmem:[#allocation5 + $0xf4] ss:$8 sps:$4 sm:$0xff]  }
  0x3e   :  { %516 = vmatpush1.bf16.msra.mxu1 %v1308_v23  ;;  %v1329_v37 = vld [vmem:[#allocation5 + $0xf0] ss:$8 sps:$4 sm:$0xff]   ;;  %v1330_v38 = vld [vmem:[#allocation5 + $0xe4] ss:$8 sps:$4 sm:$0xff]   ;;  %v1332_v39 = vld [vmem:[#allocation5 + $0xe0] ss:$8 sps:$4 sm:$0xff]  }
  0x3f   :  { %517 = vmatprep.subr.bf16.mxu1 %v1309_v24  ;;  %v1333_v40 = vld [vmem:[#allocation5 + $0xd4] ss:$8 sps:$4 sm:$0xff]   ;;  %v1335_v41 = vld [vmem:[#allocation5 + $0xd0] ss:$8 sps:$4 sm:$0xff]   ;;  %v1336_v42 = vld [vmem:[#allocation5 + $0xc4] ss:$8 sps:$4 sm:$0xff]  }
  0x40   :  { %201 = vmatpush1.bf16.msra.mxu0 %v1290_v8  ;;  %v1338_v43 = vld [vmem:[#allocation5 + $0xc0] ss:$8 sps:$4 sm:$0xff]   ;;  %v1339_v44 = vld [vmem:[#allocation5 + $0xb4] ss:$8 sps:$4 sm:$0xff]   ;;  %v1341_v45 = vld [vmem:[#allocation5 + $0xb0] ss:$8 sps:$4 sm:$0xff]  }
  0x41   :  { %202 = vmatprep.subr.bf16.mxu0 %v1291_v9  ;;  %v1342_v46 = vld [vmem:[#allocation5 + $0xa4] ss:$8 sps:$4 sm:$0xff]   ;;  %v1344_v47 = vld [vmem:[#allocation5 + $0xa0] ss:$8 sps:$4 sm:$0xff]   ;;  %v1345_v48 = vld [vmem:[#allocation5 + $0x94] ss:$8 sps:$4 sm:$0xff]  }
  0x42   :  { %518 = vmatpush1.bf16.msra.mxu1 %v1311_v25  ;;  %v1347_v49 = vld [vmem:[#allocation5 + $0x90] ss:$8 sps:$4 sm:$0xff]   ;;  %v1348_v50 = vld [vmem:[#allocation5 + $0x84] ss:$8 sps:$4 sm:$0xff]   ;;  %v1350_v51 = vld [vmem:[#allocation5 + $0x80] ss:$8 sps:$4 sm:$0xff]  }
  0x43   :  { %519 = vmatprep.subr.bf16.mxu1 %v1312_v26  ;;  %v108_v54 = vsub.s32 0, %v1612_v53  ;;  %v1618_v55 = vld [vmem:[%s1668_s5] sm:$0xff]  ;;  %v1623_v56 = vld [vmem:[%s1668_s5 + $0x8] sm:$0xff] }
  0x44   :  { %203 = vmatpush1.bf16.msra.mxu0 %v1293_v10 }
  0x45   :  { %204 = vmatprep.subr.bf16.mxu0 %v1294_v11  ;;  %v109_v57 = vrot.slane %v1618_v55, %v108_v54  ;;  %v113_v59 = vrot.slane %v1623_v56, %v108_v54 }
  0x46   :  { %520 = vmatpush1.bf16.msra.mxu1 %v1314_v27 }
  0x47   :  { %521 = vmatprep.subr.bf16.mxu1 %v1315_v28 }
  0x48   :  { %205 = vmatpush1.bf16.msra.mxu0 %v1296_v12 }
  0x49   :  { %206 = vmatprep.subr.bf16.mxu0 %v1297_v13 }
  0x4a   :  { %522 = vmatpush1.bf16.msra.mxu1 %v1317_v29 }
  0x4b   :  { %523 = vmatprep.subr.bf16.mxu1 %v1318_v30 }
  0x4c   :  { %207 = vmatpush1.bf16.msra.mxu0 %v1299_v14 }
  0x4d   :  { %208 = vmatprep.subr.bf16.mxu0 %v1300_v15 }
  0x4e   :  { %524 = vmatpush1.bf16.msra.mxu1 %v1320_v31 }
  0x4f   :  { %525 = vmatprep.subr.bf16.mxu1 %v1321_v32 }
  0x50   :  { %209 = vmatpush1.bf16.msra.mxu0 %v1302_v16 }
  0x52   :  { %526 = vmatpush1.bf16.msra.mxu1 %v1323_v33 }
  0x53   :  { %227 = vmatmul.mubr.bf16.vlgmr.msra.gmra.mxu0 %v89_v19  ;;  %527 = vmatprep.subr.bf16.mxu1 %v1324_v34 }
  0x56   :  { %528 = vmatpush1.bf16.msra.mxu1 %v1326_v35 }
  0x57   :  { %529 = vmatprep.subr.bf16.mxu1 %v1327_v36 }
  0x5a   :  { %530 = vmatpush2.bf16.msra.mxu1 %v1329_v37 }
  0x5b   :  { %531 = vmatprep.subr.bf16.mxu1 %v1330_v38 }
  0x5e   :  { %532 = vmatpush2.bf16.msra.mxu1 %v1332_v39 }
  0x5f   :  { %533 = vmatprep.subr.bf16.mxu1 %v1333_v40 }
  0x62   :  { %534 = vmatpush2.bf16.msra.mxu1 %v1335_v41 }
  0x63   :  { %535 = vmatprep.subr.bf16.mxu1 %v1336_v42 }
  0x66   :  { %536 = vmatpush2.bf16.msra.mxu1 %v1338_v43 }
  0x67   :  { %537 = vmatprep.subr.bf16.mxu1 %v1339_v44 }
  0x6a   :  { %538 = vmatpush2.bf16.msra.mxu1 %v1341_v45 }
  0x6b   :  { %539 = vmatprep.subr.bf16.mxu1 %v1342_v46 }
  0x6e   :  { %540 = vmatpush2.bf16.msra.mxu1 %v1344_v47 }
  0x6f   :  { %541 = vmatprep.subr.bf16.mxu1 %v1345_v48 }
  0x72   :  { %542 = vmatpush2.bf16.msra.mxu1 %v1347_v49  ;;  %v289_v49 = vsub.s32 1, %v1612_v53 }
  0x73   :  { %543 = vmatprep.subr.bf16.mxu1 %v1348_v50 }
  0x76   :  { %544 = vmatpush2.bf16.msra.mxu1 %v1350_v51  ;;  %v301_v51 = vsub.s32 2, %v1612_v53 }
 0x113   :  { %v228_v58 = vpop.f32.mrf.mxu0 }
 0x114   :  { %v229_v61 = vadd.f32 %v228_v58, %v109_v57 }
 0x115   :  { %v230_v60 = vpop.f32.mrf.mxu0 }
 0x116   :  { %v231_v63 = vadd.f32 %v230_v60, %v113_v59  ;;  %v237_v2 = vmax.f32 %v229_v61, 0.0 }
 0x117   :  { %v232_v62 = vpop.f32.mrf.mxu0 }
 0x118   :  { %v233_v0 = vadd.f32 %v232_v62, %v109_v57  ;;  %v238_v5 = vmax.f32 %v231_v63, 0.0  ;;  %v306_v62 = vrot.slane %v1623_v56, %v301_v51 }
 0x119   :  { %v234_v1 = vpop.f32.mrf.mxu0 }
 0x11a   :  { %v239_v3 = vmax.f32 %v233_v0, 0.0  ;;  %v235_v4 = vadd.f32 %v234_v1, %v113_v59  ;;  %v302_v59 = vrot.slane %v1618_v55, %v301_v51 }
 0x11c   :  { %v241_v6 = vadd.f32 %v239_v3, %v237_v2  ;;  %v240_v7 = vmax.f32 %v235_v4, 0.0 }
 0x11e   :  { %v242_v8 = vrot.slane %v241_v6, 4  ;;  %v248_v9 = vadd.f32 %v240_v7, %v238_v5 }
 0x120   :  { %v243_v10 = vadd.f32 %v242_v8, %v241_v6  ;;  %v249_v11 = vrot.slane %v248_v9, 4  ;;  %v1353_v8 = vld [vmem:[#allocation7 + $0x74] ss:$8 sps:$4 sm:$0xff]  }
 0x121   :  { %832 = vmatprep.subr.bf16.mxu0 %v1353_v8 }
 0x122   :  { %v244_v12 = vrot.slane %v243_v10, 2  ;;  %v250_v13 = vadd.f32 %v249_v11, %v248_v9  ;;  %v1351_v9 = vld [vmem:[#allocation7 + $0x70] ss:$8 sps:$4 sm:$0xff]   ;;  %v1354_v11 = vld [vmem:[#allocation7 + $0x60] ss:$8 sps:$4 sm:$0xff]  }
 0x123   :  { %833 = vmatpush1.bf16.msra.mxu0 %v1351_v9 }
 0x124   :  { %v245_v14 = vadd.f32 %v244_v12, %v243_v10  ;;  %v251_v15 = vrot.slane %v250_v13, 2  ;;  %v1356_v10 = vld [vmem:[#allocation7 + $0x64] ss:$8 sps:$4 sm:$0xff]   ;;  %v1359_v12 = vld [vmem:[#allocation7 + $0x54] ss:$8 sps:$4 sm:$0xff]  }
 0x125   :  { %834 = vmatprep.subr.bf16.mxu0 %v1356_v10 }
 0x126   :  { %v246_v16 = vrot.slane %v245_v14, 1  ;;  %v252_v17 = vadd.f32 %v251_v15, %v250_v13  ;;  %v1357_v13 = vld [vmem:[#allocation7 + $0x50] ss:$8 sps:$4 sm:$0xff]   ;;  %v1360_v15 = vld [vmem:[#allocation7 + $0x40] ss:$8 sps:$4 sm:$0xff]  }
 0x127   :  { %835 = vmatpush1.bf16.msra.mxu0 %v1354_v11 }
 0x128   :  { %v247_v18 = vadd.f32 %v246_v16, %v245_v14  ;;  %v253_v19 = vrot.slane %v252_v17, 1  ;;  %836 = vmatprep.subr.bf16.mxu0 %v1359_v12  ;;  %v1362_v14 = vld [vmem:[#allocation7 + $0x44] ss:$8 sps:$4 sm:$0xff]   ;;  %v1365_v16 = vld [vmem:[#allocation7 + $0x34] ss:$8 sps:$4 sm:$0xff]  }
 0x12a   :  { %v255_v20 = vmul.f32 0.0625, %v247_v18  ;;  %v254_v21 = vadd.f32 %v253_v19, %v252_v17  ;;  %v1363_v17 = vld [vmem:[#allocation7 + $0x30] ss:$8 sps:$4 sm:$0xff]   ;;  %v1368_v18 = vld [vmem:[#allocation7 + $0x24] ss:$8 sps:$4 sm:$0xff]  }
 0x12b   :  { %837 = vmatpush1.bf16.msra.mxu0 %v1357_v13  ;;  %v1366_v19 = vld [vmem:[#allocation7 + $0x20] ss:$8 sps:$4 sm:$0xff]  }
 0x12c   :  { %v257_v22 = vsub.f32 %v237_v2, %v255_v20  ;;  %v259_v23 = vsub.f32 %v239_v3, %v255_v20  ;;  %v256_v24 = vmul.f32 0.0625, %v254_v21  ;;  %838 = vmatprep.subr.bf16.mxu0 %v1362_v14  ;;  %v1371_v20 = vld [vmem:[#allocation7 + $0x14] ss:$8 sps:$4 sm:$0xff]   ;;  %v1369_v21 = vld [vmem:[#allocation7 + $0x10] ss:$8 sps:$4 sm:$0xff]  }
 0x12e   :  { %v261_v25 = vmul.f32 %v257_v22, %v257_v22  ;;  %v263_v26 = vmul.f32 %v259_v23, %v259_v23  ;;  %v260_v27 = vsub.f32 %v240_v7, %v256_v24  ;;  %v258_v28 = vsub.f32 %v238_v5, %v256_v24  ;;  %v1377_v24 = vld [vmem:[#allocation7 + $0xf4] ss:$8 sps:$4 sm:$0xff]  }
 0x12f   :  { %839 = vmatpush1.bf16.msra.mxu0 %v1360_v15 }
 0x130   :  { %v265_v29 = vadd.f32 %v263_v26, %v261_v25  ;;  %v264_v30 = vmul.f32 %v260_v27, %v260_v27  ;;  %v262_v31 = vmul.f32 %v258_v28, %v258_v28  ;;  %840 = vmatprep.subr.bf16.mxu0 %v1365_v16  ;;  %v1375_v25 = vld [vmem:[#allocation7 + $0xf0] ss:$8 sps:$4 sm:$0xff]   ;;  %v1380_v26 = vld [vmem:[#allocation7 + $0xe4] ss:$8 sps:$4 sm:$0xff]  }
 0x132   :  { %v266_v32 = vrot.slane %v265_v29, 4  ;;  %v272_v33 = vadd.f32 %v264_v30, %v262_v31  ;;  %v1386_v30 = vld [vmem:[#allocation7 + $0xc4] ss:$8 sps:$4 sm:$0xff]   ;;  %v1384_v31 = vld [vmem:[#allocation7 + $0xc0] ss:$8 sps:$4 sm:$0xff]  }
 0x133   :  { %841 = vmatpush1.bf16.msra.mxu0 %v1363_v17 }
 0x134   :  { %v267_v34 = vadd.f32 %v266_v32, %v265_v29  ;;  %v273_v35 = vrot.slane %v272_v33, 4  ;;  %842 = vmatprep.subr.bf16.mxu0 %v1368_v18  ;;  %v1381_v29 = vld [vmem:[#allocation7 + $0xd0] ss:$8 sps:$4 sm:$0xff]   ;;  %v1389_v32 = vld [vmem:[#allocation7 + $0xb4] ss:$8 sps:$4 sm:$0xff]  }
 0x136   :  { %v268_v36 = vrot.slane %v267_v34, 2  ;;  %v274_v37 = vadd.f32 %v273_v35, %v272_v33  ;;  %v1387_v33 = vld [vmem:[#allocation7 + $0xb0] ss:$8 sps:$4 sm:$0xff]   ;;  %v1390_v35 = vld [vmem:[#allocation7 + $0xa0] ss:$8 sps:$4 sm:$0xff]  }
 0x137   :  { %843 = vmatpush1.bf16.msra.mxu0 %v1366_v19 }
 0x138   :  { %v269_v38 = vadd.f32 %v268_v36, %v267_v34  ;;  %v275_v39 = vrot.slane %v274_v37, 2  ;;  %844 = vmatprep.subr.bf16.mxu0 %v1371_v20  ;;  %v1392_v34 = vld [vmem:[#allocation7 + $0xa4] ss:$8 sps:$4 sm:$0xff]   ;;  %v1395_v36 = vld [vmem:[#allocation7 + $0x94] ss:$8 sps:$4 sm:$0xff]  }
 0x13a   :  { %v270_v40 = vrot.slane %v269_v38, 1  ;;  %v276_v41 = vadd.f32 %v275_v39, %v274_v37  ;;  %v1393_v37 = vld [vmem:[#allocation7 + $0x90] ss:$8 sps:$4 sm:$0xff]   ;;  %v1398_v39 = vld [vmem:[#allocation7 + $0x84] ss:$8 sps:$4 sm:$0xff]  }
 0x13b   :  { %845 = vmatpush1.bf16.msra.mxu0 %v1369_v21 }
 0x13c   :  { %v271_v42 = vadd.f32 %v270_v40, %v269_v38  ;;  %v277_v43 = vrot.slane %v276_v41, 1  ;;  %v1396_v38 = vld [vmem:[#allocation7 + $0x80] ss:$8 sps:$4 sm:$0xff]   ;;  %v347_v40 = vsub.s32 3, %v1612_v53 }
 0x13e   :  { %v279_v44 = vmul.f32 0.0625, %v271_v42  ;;  %v278_v45 = vadd.f32 %v277_v43, %v276_v41  ;;  %v348_v41 = vrot.slane %v1618_v55, %v347_v40  ;;  %v352_v43 = vrot.slane %v1623_v56, %v347_v40 }
 0x140   :  { %v281_v46 = vadd.f32 1e-05, %v279_v44  ;;  %v280_v47 = vmul.f32 0.0625, %v278_v45 }
 0x142   :  { %1415 = vrsqrt.f32 %v281_v46  ;;  %v282_v48 = vadd.f32 1e-05, %v280_v47 }
 0x144   :  { %1417 = vrsqrt.f32 %v282_v48 }
 0x14f   :  { %v1416_v50 = vpop.eup %1415 }
 0x150   :  { %v285_v52 = vmul.f32 %v1416_v50, %v1618_v55 }
 0x151   :  { %v1418_v54 = vpop.eup %1417 }
 0x152   :  { %v290_v57 = vrot.slane %v285_v52, %v289_v49  ;;  %v286_v58 = vmul.f32 %v1418_v54, %v1623_v56 }
 0x154   :  { %v297_v60 = vmul.f32 %v290_v57, %v259_v23  ;;  %v294_v61 = vrot.slane %v286_v58, %v289_v49  ;;  %v295_v63 = vmul.f32 %v290_v57, %v257_v22  ;;  %v1374_v22 = vld [vmem:[#allocation7 + $0x4] ss:$8 sps:$4 sm:$0xff]   ;;  %v1372_v23 = vld [vmem:[#allocation7] ss:$8 sps:$4 sm:$0xff]  }
 0x155   :  { %846 = vmatprep.subr.bf16.mxu0 %v1374_v22 }
 0x156   :  { %v296_v0 = vmul.f32 %v294_v61, %v258_v28  ;;  %v298_v1 = vmul.f32 %v294_v61, %v260_v27  ;;  %v307_v2 = vadd.f32 %v302_v59, %v295_v63  ;;  %v309_v3 = vadd.f32 %v302_v59, %v297_v60  ;;  %847 = vmatpush1.bf16.msra.mxu0 %v1372_v23  ;;  %v1378_v27 = vld [vmem:[#allocation7 + $0xe0] ss:$8 sps:$4 sm:$0xff]   ;;  %v1383_v28 = vld [vmem:[#allocation7 + $0xd4] ss:$8 sps:$4 sm:$0xff]  }
 0x157   :  { %848 = vmatprep.subr.bf16.mxu0 %v1377_v24 }
 0x158   :  { %v308_v4 = vadd.f32 %v306_v62, %v296_v0  ;;  %v310_v5 = vadd.f32 %v306_v62, %v298_v1  ;;  %v311_v7 = vpack.c.bf16 %v309_v3, %v307_v2 }
 0x15a   :  { %v312_v6 = vpack.c.bf16 %v310_v5, %v308_v4  ;;  %849 = vmatpush2.bf16.msra.mxu0 %v1375_v25 }
 0x15b   :  { %850 = vmatprep.subr.bf16.mxu0 %v1380_v26 }
 0x15c   :  { %545 = vmatprep.mubr.bf16.mxu1 %v312_v6 }
 0x15d   :  { %546 = vmatmul.mubr.bf16.vlgmr.msra.gmra.mxu1 %v311_v7 }
 0x15e   :  { %851 = vmatpush2.bf16.msra.mxu0 %v1378_v27 }
 0x15f   :  { %852 = vmatprep.subr.bf16.mxu0 %v1383_v28 }
 0x162   :  { %853 = vmatpush2.bf16.msra.mxu0 %v1381_v29 }
 0x163   :  { %854 = vmatprep.subr.bf16.mxu0 %v1386_v30 }
 0x166   :  { %855 = vmatpush2.bf16.msra.mxu0 %v1384_v31 }
 0x167   :  { %856 = vmatprep.subr.bf16.mxu0 %v1389_v32 }
 0x16a   :  { %857 = vmatpush2.bf16.msra.mxu0 %v1387_v33 }
 0x16b   :  { %858 = vmatprep.subr.bf16.mxu0 %v1392_v34 }
 0x16e   :  { %859 = vmatpush2.bf16.msra.mxu0 %v1390_v35 }
 0x16f   :  { %860 = vmatprep.subr.bf16.mxu0 %v1395_v36  ;;  %v608_v36 = vsub.s32 4, %v1612_v53 }
 0x172   :  { %861 = vmatpush2.bf16.msra.mxu0 %v1393_v37 }
 0x173   :  { %862 = vmatprep.subr.bf16.mxu0 %v1398_v39 }
 0x176   :  { %863 = vmatpush2.bf16.msra.mxu0 %v1396_v38  ;;  %v620_v38 = vsub.s32 5, %v1612_v53 }
 0x21d   :  { %v547_v42 = vpop.f32.mrf.mxu1 }
 0x21e   :  { %v548_v45 = vadd.f32 %v547_v42, %v348_v41 }
 0x21f   :  { %v549_v44 = vpop.f32.mrf.mxu1 }
 0x220   :  { %v550_v47 = vadd.f32 %v549_v44, %v352_v43  ;;  %v556_v50 = vmax.f32 %v548_v45, 0.0 }
 0x221   :  { %v551_v46 = vpop.f32.mrf.mxu1 }
 0x222   :  { %v552_v48 = vadd.f32 %v551_v46, %v348_v41  ;;  %v557_v54 = vmax.f32 %v550_v47, 0.0  ;;  %v625_v47 = vrot.slane %v1623_v56, %v620_v38 }
 0x223   :  { %v553_v49 = vpop.f32.mrf.mxu1 }
 0x224   :  { %v558_v51 = vmax.f32 %v552_v48, 0.0  ;;  %v554_v52 = vadd.f32 %v553_v49, %v352_v43  ;;  %v621_v43 = vrot.slane %v1618_v55, %v620_v38 }
 0x226   :  { %v560_v57 = vadd.f32 %v558_v51, %v556_v50  ;;  %v559_v58 = vmax.f32 %v554_v52, 0.0 }
 0x228   :  { %v561_v59 = vrot.slane %v560_v57, 4  ;;  %v567_v60 = vadd.f32 %v559_v58, %v557_v54 }
 0x22a   :  { %v562_v61 = vadd.f32 %v561_v59, %v560_v57  ;;  %v568_v62 = vrot.slane %v567_v60, 4  ;;  %v1399_v59 = vld [vmem:[#allocation8 + $0x78] sm:$0xff]  }
 0x22b   :  { %1247 = vmatprep.subr.bf16.mxu1 %v1399_v59 }
 0x22c   :  { %v563_v63 = vrot.slane %v562_v61, 2  ;;  %v569_v0 = vadd.f32 %v568_v62, %v567_v60  ;;  %v1400_v60 = vld [vmem:[#allocation8 + $0x38] sm:$0xff]   ;;  %v1402_v62 = vld [vmem:[#allocation8 + $0x30] sm:$0xff]  }
 0x22d   :  { %1248 = vmatpush3.bf16.msra.mxu1 %v1400_v60 }
 0x22e   :  { %v564_v1 = vadd.f32 %v563_v63, %v562_v61  ;;  %v570_v2 = vrot.slane %v569_v0, 2  ;;  %v1401_v61 = vld [vmem:[#allocation8 + $0x70] sm:$0xff]   ;;  %v1403_v63 = vld [vmem:[#allocation8 + $0x68] sm:$0xff]  }
 0x22f   :  { %1249 = vmatprep.subr.bf16.mxu1 %v1401_v61 }
 0x230   :  { %v565_v3 = vrot.slane %v564_v1, 1  ;;  %v571_v4 = vadd.f32 %v570_v2, %v569_v0  ;;  %v1404_v0 = vld [vmem:[#allocation8 + $0x28] sm:$0xff]   ;;  %v1406_v2 = vld [vmem:[#allocation8 + $0x20] sm:$0xff]  }
 0x231   :  { %1250 = vmatpush3.bf16.msra.mxu1 %v1402_v62 }
 0x232   :  { %v566_v5 = vadd.f32 %v565_v3, %v564_v1  ;;  %v572_v6 = vrot.slane %v571_v4, 1  ;;  %1251 = vmatprep.subr.bf16.mxu1 %v1403_v63  ;;  %v1405_v1 = vld [vmem:[#allocation8 + $0x60] sm:$0xff]   ;;  %v1407_v3 = vld [vmem:[#allocation8 + $0x58] sm:$0xff]  }
 0x234   :  { %v574_v7 = vmul.f32 0.0625, %v566_v5  ;;  %v573_v8 = vadd.f32 %v572_v6, %v571_v4  ;;  %v1408_v4 = vld [vmem:[#allocation8 + $0x18] sm:$0xff]   ;;  %v1409_v5 = vld [vmem:[#allocation8 + $0x50] sm:$0xff]  }
 0x235   :  { %1252 = vmatpush3.bf16.msra.mxu1 %v1404_v0  ;;  %v1410_v6 = vld [vmem:[#allocation8 + $0x10] sm:$0xff]  }
 0x236   :  { %v576_v9 = vsub.f32 %v556_v50, %v574_v7  ;;  %v578_v10 = vsub.f32 %v558_v51, %v574_v7  ;;  %v575_v11 = vmul.f32 0.0625, %v573_v8  ;;  %1253 = vmatprep.subr.bf16.mxu1 %v1405_v1  ;;  %v1411_v7 = vld [vmem:[#allocation8 + $0x48] sm:$0xff]  }
 0x237   :  { %v1412_v8 = vld [vmem:[#allocation8 + $0x8] sm:$0xff]  }
 0x238   :  { %v580_v12 = vmul.f32 %v576_v9, %v576_v9  ;;  %v582_v13 = vmul.f32 %v578_v10, %v578_v10  ;;  %v577_v14 = vsub.f32 %v557_v54, %v575_v11  ;;  %v579_v15 = vsub.f32 %v559_v58, %v575_v11 }
 0x239   :  { %1254 = vmatpush3.bf16.msra.mxu1 %v1406_v2  ;;  %v666_v11 = vsub.s32 6, %v1612_v53 }
 0x23a   :  { %v584_v16 = vadd.f32 %v582_v13, %v580_v12  ;;  %v581_v17 = vmul.f32 %v577_v14, %v577_v14  ;;  %v583_v18 = vmul.f32 %v579_v15, %v579_v15  ;;  %1255 = vmatprep.subr.bf16.mxu1 %v1407_v3 }
 0x23b   :  { %v667_v12 = vrot.slane %v1618_v55, %v666_v11 }
 0x23c   :  { %v585_v19 = vrot.slane %v584_v16, 4  ;;  %v591_v20 = vadd.f32 %v583_v18, %v581_v17 }
 0x23d   :  { %1256 = vmatpush3.bf16.msra.mxu1 %v1408_v4 }
 0x23e   :  { %v586_v21 = vadd.f32 %v585_v19, %v584_v16  ;;  %v592_v22 = vrot.slane %v591_v20, 4  ;;  %1257 = vmatprep.subr.bf16.mxu1 %v1409_v5 }
 0x240   :  { %v587_v23 = vrot.slane %v586_v21, 2  ;;  %v593_v24 = vadd.f32 %v592_v22, %v591_v20 }
 0x241   :  { %1258 = vmatpush3.bf16.msra.mxu1 %v1410_v6 }
 0x242   :  { %v588_v25 = vadd.f32 %v587_v23, %v586_v21  ;;  %v594_v26 = vrot.slane %v593_v24, 2  ;;  %1259 = vmatprep.subr.bf16.mxu1 %v1411_v7  ;;  %v927_v7 = vsub.s32 7, %v1612_v53 }
 0x244   :  { %v589_v27 = vrot.slane %v588_v25, 1  ;;  %v595_v28 = vadd.f32 %v594_v26, %v593_v24 }
 0x245   :  { %1260 = vmatpush3.bf16.msra.mxu1 %v1412_v8 }
 0x246   :  { %v590_v29 = vadd.f32 %v589_v27, %v588_v25  ;;  %v596_v30 = vrot.slane %v595_v28, 1 }
 0x248   :  { %v598_v31 = vmul.f32 0.0625, %v590_v29  ;;  %v597_v32 = vadd.f32 %v596_v30, %v595_v28 }
 0x24a   :  { %v600_v33 = vadd.f32 1e-05, %v598_v31  ;;  %v599_v34 = vmul.f32 0.0625, %v597_v32 }
 0x24c   :  { %1419 = vrsqrt.f32 %v600_v33  ;;  %v601_v35 = vadd.f32 1e-05, %v599_v34 }
 0x24e   :  { %1421 = vrsqrt.f32 %v601_v35 }
 0x259   :  { %v1420_v37 = vpop.eup %1419 }
 0x25a   :  { %v604_v39 = vmul.f32 %v1420_v37, %v1618_v55 }
 0x25b   :  { %v1422_v40 = vpop.eup %1421 }
 0x25c   :  { %v609_v41 = vrot.slane %v604_v39, %v608_v36  ;;  %v605_v42 = vmul.f32 %v1422_v40, %v1623_v56 }
 0x25e   :  { %v614_v44 = vmul.f32 %v609_v41, %v576_v9  ;;  %v616_v45 = vmul.f32 %v609_v41, %v578_v10  ;;  %v613_v46 = vrot.slane %v605_v42, %v608_v36  ;;  %v1413_v9 = vld [vmem:[#allocation8 + $0x40] sm:$0xff]  }
 0x25f   :  { %v1414_v10 = vld [vmem:[#allocation8] sm:$0xff]   ;;  %1261 = vmatprep.subr.bf16.mxu1 %v1413_v9 }
 0x260   :  { %v617_v48 = vmul.f32 %v613_v46, %v579_v15  ;;  %v615_v49 = vmul.f32 %v613_v46, %v577_v14  ;;  %v628_v50 = vadd.f32 %v621_v43, %v616_v45  ;;  %v626_v51 = vadd.f32 %v621_v43, %v614_v44  ;;  %1262 = vmatpush3.bf16.msra.mxu1 %v1414_v10 }
 0x261   :  { %v671_v14 = vrot.slane %v1623_v56, %v666_v11 }
 0x262   :  { %v627_v52 = vadd.f32 %v625_v47, %v615_v49  ;;  %v629_v54 = vadd.f32 %v625_v47, %v617_v48  ;;  %v630_v58 = vpack.c.bf16 %v628_v50, %v626_v51 }
 0x264   :  { %v631_v57 = vpack.c.bf16 %v629_v54, %v627_v52 }
 0x266   :  { %864 = vmatprep.mubr.bf16.mxu0 %v631_v57 }
 0x267   :  { %865 = vmatmul.mubr.bf16.vlgmr.msra.gmra.mxu0 %v630_v58 }
 0x327   :  { %v866_v13 = vpop.f32.mrf.mxu0 }
 0x328   :  { %v867_v16 = vadd.f32 %v866_v13, %v667_v12  ;;  %v1228_v13 = vld [vmem:[%s1668_s5 + $0x10] ss:$0 sm:$0xff] }
 0x329   :  { %v868_v15 = vpop.f32.mrf.mxu0 }
 0x32a   :  { %v869_v18 = vadd.f32 %v868_v15, %v671_v14  ;;  %v875_v21 = vmax.f32 %v867_v16, 0.0 }
 0x32b   :  { %v870_v17 = vpop.f32.mrf.mxu0 }
 0x32c   :  { %v871_v19 = vadd.f32 %v870_v17, %v667_v12  ;;  %v876_v24 = vmax.f32 %v869_v18, 0.0  ;;  %v1229_v17 = vld [vmem:[%s1668_s5 + $0x18] ss:$0 sm:$0xff]  ;;  %s1544_s5 = smov [#allocation10]  }
 0x32d   :  { %v872_v20 = vpop.f32.mrf.mxu0  ;;  %s1134_s13 = sshll.u32 %s1544_s5, 4  ;;  %s1135_s13 = int_to_ptr.vmem [resolvable:$true] %s1134_s13 }
 0x32e   :  { %v877_v22 = vmax.f32 %v871_v19, 0.0  ;;  %v873_v23 = vadd.f32 %v872_v20, %v671_v14  ;;  %s1507_s14 = scalar_lea.vmem %s1135_s13, 256  ;;  %p1512_p7 = scmp.lt.s32.totalorder %s1135_s13, %s1135_s13 }
 0x32f   :  { %p1508_p6 = scmp.ne.s32.totalorder %s1135_s13, %s1507_s14  ;;  %p1513_p8 = scmp.lt.s32.totalorder %s1507_s14, %s1507_s14 }
 0x330   :  { %v879_v25 = vadd.f32 %v877_v22, %v875_v21  ;;  %v878_v26 = vmax.f32 %v873_v23, 0.0 }
 0x331   :  { %p1514_p9 = por %p1513_p8, %p1512_p7 }
 0x332   :  { %v880_v27 = vrot.slane %v879_v25, 4  ;;  %v886_v28 = vadd.f32 %v878_v26, %v876_v24 }
 0x333   :  { %p1515_p10 = pnand %p1514_p9, %p1508_p6 }
 0x334   :  { %v881_v29 = vadd.f32 %v880_v27, %v879_v25  ;;  %v887_v30 = vrot.slane %v886_v28, 4 }
 0x336   :  { %v882_v31 = vrot.slane %v881_v29, 2  ;;  %v888_v32 = vadd.f32 %v887_v30, %v886_v28 }
 0x338   :  { %v883_v33 = vadd.f32 %v882_v31, %v881_v29  ;;  %v889_v34 = vrot.slane %v888_v32, 2 }
 0x33a   :  { %v884_v35 = vrot.slane %v883_v33, 1  ;;  %v890_v36 = vadd.f32 %v889_v34, %v888_v32 }
 0x33c   :  { %v885_v37 = vadd.f32 %v884_v35, %v883_v33  ;;  %v891_v38 = vrot.slane %v890_v36, 1 }
 0x33e   :  { %v893_v39 = vmul.f32 0.0625, %v885_v37  ;;  %v892_v40 = vadd.f32 %v891_v38, %v890_v36 }
 0x340   :  { %v895_v41 = vsub.f32 %v875_v21, %v893_v39  ;;  %v897_v42 = vsub.f32 %v877_v22, %v893_v39  ;;  %v894_v43 = vmul.f32 0.0625, %v892_v40 }
 0x342   :  { %v899_v44 = vmul.f32 %v895_v41, %v895_v41  ;;  %v901_v45 = vmul.f32 %v897_v42, %v897_v42  ;;  %v896_v46 = vsub.f32 %v876_v24, %v894_v43  ;;  %v898_v47 = vsub.f32 %v878_v26, %v894_v43  ;;  %v1230_v24 = vld [vmem:[%s1669_s6] ss:$0 sm:$0xff] }
 0x344   :  { %v903_v48 = vadd.f32 %v901_v45, %v899_v44  ;;  %v900_v49 = vmul.f32 %v896_v46, %v896_v46  ;;  %v902_v50 = vmul.f32 %v898_v47, %v898_v47 }
 0x346   :  { %v904_v51 = vrot.slane %v903_v48, 4  ;;  %v910_v52 = vadd.f32 %v902_v50, %v900_v49 }
 0x348   :  { %v905_v54 = vadd.f32 %v904_v51, %v903_v48  ;;  %v911_v57 = vrot.slane %v910_v52, 4 }
 0x34a   :  { %v906_v58 = vrot.slane %v905_v54, 2  ;;  %v912_v59 = vadd.f32 %v911_v57, %v910_v52 }
 0x34c   :  { %v907_v60 = vadd.f32 %v906_v58, %v905_v54  ;;  %v913_v61 = vrot.slane %v912_v59, 2 }
 0x34e   :  { %v908_v62 = vrot.slane %v907_v60, 1  ;;  %v914_v63 = vadd.f32 %v913_v61, %v912_v59 }
 0x350   :  { %v909_v0 = vadd.f32 %v908_v62, %v907_v60  ;;  %v915_v1 = vrot.slane %v914_v63, 1 }
 0x352   :  { %v917_v2 = vmul.f32 0.0625, %v909_v0  ;;  %v916_v3 = vadd.f32 %v915_v1, %v914_v63 }
 0x354   :  { %v919_v4 = vadd.f32 1e-05, %v917_v2  ;;  %v918_v5 = vmul.f32 0.0625, %v916_v3 }
 0x356   :  { %1423 = vrsqrt.f32 %v919_v4  ;;  %v920_v6 = vadd.f32 1e-05, %v918_v5 }
 0x358   :  { %1425 = vrsqrt.f32 %v920_v6 }
 0x363   :  { %v1424_v8 = vpop.eup %1423 }
 0x364   :  { %v923_v9 = vmul.f32 %v1424_v8, %v1618_v55 }
 0x365   :  { %v1426_v10 = vpop.eup %1425 }
 0x366   :  { %v928_v11 = vrot.slane %v923_v9, %v927_v7  ;;  %v924_v12 = vmul.f32 %v1426_v10, %v1623_v56 }
 0x368   :  { %v933_v14 = vmul.f32 %v928_v11, %v895_v41  ;;  %v935_v15 = vmul.f32 %v928_v11, %v897_v42  ;;  %v932_v16 = vrot.slane %v924_v12, %v927_v7 }
 0x36a   :  { %v936_v18 = vmul.f32 %v932_v16, %v898_v47  ;;  %v934_v53 = vmul.f32 %v932_v16, %v896_v46  ;;  %v945_v19 = vadd.f32 %v1228_v13, %v933_v14  ;;  %v947_v20 = vadd.f32 %v1228_v13, %v935_v15 }
 0x36c   :  { %v946_v55 = vadd.f32 %v1229_v17, %v934_v53  ;;  %v948_v21 = vadd.f32 %v1229_v17, %v936_v18  ;;  %v949_v23 = vpack.c.bf16 %v947_v20, %v945_v19 }
 0x36e   :  { %v950_v22 = vpack.c.bf16 %v948_v21, %v946_v55 }
 0x370   :  { %1118 = vmatprep.mubr.bf16.mxu1 %v950_v22 }
 0x371   :  { %1119 = vmatmul.mubr.bf16.vlgmr.msra.gmra.mxu1 %v949_v23 }
 0x431   :  { %v1263_v56 = vpop.f32.mrf.mxu1 }
 0x433   :  { %v1264_v25 = vpop.f32.mrf.mxu1 }
 0x434   :  { %v1265_v26 = vadd.f32 %v1264_v25, %v1263_v56 }
 0x435   :  { %v1266_v27 = vpop.f32.mrf.mxu1 }
 0x436   :  { %v1121_v28 = vadd.f32 %v1265_v26, %v1230_v24 }
 0x437   :  { %v1267_v29 = vpop.f32.mrf.mxu1 }
 0x438   :  { %1127 = vst [vmem:[#allocation10] sm:$0xff] %v1121_v28  ;;  %v1268_v30 = vadd.f32 %v1267_v29, %v1266_v27 }
 0x43a   :  { %v1124_v31 = vadd.f32 %v1268_v30, %v1230_v24 }
 0x43c   :  { %1128 = vst [vmem:[#allocation10 + $0x8] sm:$0xff] %v1124_v31 }
 0x43d   :  { %1518 = shalt.err (!%p1515_p10)
}
 0x43e   :  { %1140 = dma.vmem_to_hbm [thread:$0]  %s1135_s13, 256, %s1670_s7, [#allocation4], %s1537_s29, %s1537_s29, %s1538_s30  }
 0x43f   :  { %1533 = dma.done.wait [#allocation4], 256  }
 0x440   :  { %1534 = vsyncadd [#allocation4], 4294967040 }
 0x441   :  { %1144 = vsyncpa [#allocation3], 1 }
 0x442   :  { %1145 = vsyncpa [#allocation6], 1 }
 0x443   :  { %1146 = vsyncpa [#allocation9], 1 }
 0x444   :  { %1147 = vsyncpa [#allocation4], 1 }

</bundles_post_ra>
